<compile_context>
chip_gen: v7x
topology: tpu7x:2x2x1
jax: 0.10.0
libtpu: 0.0.40
codegen_flags: <defaults>
</compile_context>

<pallas_src>
import math
import functools

import jax
import jax.numpy as jnp
from jax import lax
from jax.experimental import pallas as pl
from jax.experimental.pallas import tpu as pltpu


def _round_up(v, m):
    return ((v + m - 1) // m) * m


def _self_attn_kernel(x_ref, w_in_ref, b_in_ref, w_out_ref, b_out_ref, o_ref,
                      *, num_heads, dim_head, causal):
    """One grid step = `Bb` batch elements: fused QKV projection -> per-head
    scaled-dot-product softmax attention -> head concat -> single
    out-projection (lane-dense padded columns) + bias."""
    Bb, S, _ = x_ref.shape
    E = num_heads * dim_head
    cd = w_in_ref.dtype                           # compute dtype (f32 or bf16)
    scale = 1.0 / math.sqrt(dim_head)

    if causal:
        row = lax.broadcasted_iota(jnp.int32, (S, S), 0)
        col = lax.broadcasted_iota(jnp.int32, (S, S), 1)
        neg_mask = col > row                      # strict upper triangle

    for b in range(Bb):                           # static, small Bb
        xb = x_ref[b]                             # (S, E)

        # Fused QKV projection (single MXU matmul per batch element, f32 acc).
        qkv = jnp.dot(xb, w_in_ref[...],
                      preferred_element_type=jnp.float32) + b_in_ref[...]  # (S, 3E)

        # Fold the attention scale into Q once (one VPU mul).
        q = qkv[:, 0 * E:1 * E] * scale
        k = qkv[:, 1 * E:2 * E]
        v = qkv[:, 2 * E:3 * E]

        heads = []
        for h in range(num_heads):                # static, unrolled (small H)
            sl = slice(h * dim_head, (h + 1) * dim_head)
            qh = q[:, sl].astype(cd)              # (S, Dh)
            kh = k[:, sl].astype(cd)              # (S, Dh)
            vh = v[:, sl].astype(cd)              # (S, Dh)

            # Q . K^T without materializing kh.T: contract last dims directly.
            s = lax.dot_general(qh, kh, (((1,), (1,)), ((), ())),
                                preferred_element_type=jnp.float32)  # (S, S)
            if causal:
                # Keep the large-negative mask on the f32 scores only.
                s = jnp.where(neg_mask, -1e30, s)

            # Numerically-stable softmax in f32; exact reciprocal on the EUP.
            m = jnp.max(s, axis=-1, keepdims=True)
            p = jnp.exp(s - m)
            denom = jnp.sum(p, axis=-1, keepdims=True)
            p = p * pl.reciprocal(denom)

            oh = jnp.dot(p.astype(cd), vh,
                         preferred_element_type=jnp.float32)         # (S, Dh)
            heads.append(oh.astype(cd))

        # Reassemble heads and run ONE out-projection matmul against the
        # lane-padded w_out (E, E_pad): full-K contraction, lane-dense store.
        o_cat = jnp.concatenate(heads, axis=-1) if num_heads > 1 else heads[0]
        out = jnp.dot(o_cat, w_out_ref[...],
                      preferred_element_type=jnp.float32) + b_out_ref[...]
        o_ref[b] = out.astype(o_ref.dtype)


def self_attention(x, params, *, num_heads, causal=False, compute_dtype=None,
                   block_b=None):
    """x: (B, S, E).  params: w_in (E, 3E), b_in (3E,), w_out (E, E), b_out (E,)
    with weights already stored (in_dim, out_dim).  `compute_dtype=jnp.bfloat16`
    casts activations/weights at the kernel boundary (f32 accumulation kept) —
    recommended on v6e/v7x."""
    B, S, E = x.shape
    assert E % num_heads == 0
    dim_head = E // num_heads
    out_dtype = x.dtype

    # Lane-dense output: pad the out-projection columns to a multiple of 128.
    E_pad = _round_up(E, 128)

    w_in = params["w_in"]
    w_out = params["w_out"]
    b_in = params["b_in"].reshape(1, 3 * E).astype(jnp.float32)
    b_out = params["b_out"].astype(jnp.float32)

    if E_pad != E:
        w_out = jnp.zeros((E, E_pad), w_out.dtype).at[:, :E].set(w_out)
        b_out = jnp.zeros((E_pad,), jnp.float32).at[:E].set(b_out)
    b_out = b_out.reshape(1, E_pad)

    if compute_dtype is not None:
        x = x.astype(compute_dtype)
        w_in = w_in.astype(compute_dtype)
        w_out = w_out.astype(compute_dtype)

    # Batch blocking: amortize the ~0.35 us per-grid-step overhead.  For tiny
    # batches fold everything into one step; cap Bb to bound the x/out VMEM
    # blocks.  (On v7x, keeping >=2 grid steps lets both TensorCores work.)
    if block_b is None:
        block_b = 1
        for cand in range(min(B, 8), 0, -1):
            if B % cand == 0:
                block_b = cand
                break
    assert B % block_b == 0

    kernel = functools.partial(_self_attn_kernel,
                               num_heads=num_heads,
                               dim_head=dim_head,
                               causal=causal)

    # Constant index_maps keep the (small) weights VMEM-resident across the
    # batch grid.
    const2d = lambda shape: pl.BlockSpec(shape, lambda i: (0, 0))

    out = pl.pallas_call(
        kernel,
        out_shape=jax.ShapeDtypeStruct((B, S, E_pad), out_dtype),
        grid=(B // block_b,),
        in_specs=[
            pl.BlockSpec((block_b, S, E), lambda i: (i, 0, 0)),   # x
            const2d((E, 3 * E)),                                  # w_in
            const2d((1, 3 * E)),                                  # b_in
            const2d((E, E_pad)),                                  # w_out (padded)
            const2d((1, E_pad)),                                  # b_out (padded)
        ],
        out_specs=pl.BlockSpec((block_b, S, E_pad), lambda i: (i, 0, 0)),
        compiler_params=pltpu.CompilerParams(
            dimension_semantics=("parallel",),        # both TCs on v7x
            vmem_limit_bytes=32 * 1024 * 1024),       # bump v5e's 16 MiB default
    )(x, w_in, b_in, w_out, b_out)

    return out[:, :, :E] if E_pad != E else out


def reference_self_attention(x, params, *, num_heads, causal=False):
    """Pure-JAX reference reproducing the PyTorch SelfAttention.forward."""
    B, S, E = x.shape
    dim_head = E // num_heads
    qkv = x @ params["w_in"] + params["b_in"]
    q, k, v = jnp.split(qkv, 3, axis=-1)
    q = q.reshape(B, S, num_heads, dim_head).transpose(0, 2, 1, 3)
    k = k.reshape(B, S, num_heads, dim_head).transpose(0, 2, 1, 3)
    v = v.reshape(B, S, num_heads, dim_head).transpose(0, 2, 1, 3)
    w = jnp.einsum("bhqd,bhkd->bhqk", q, k)
    if causal:
        mask = jnp.triu(jnp.ones((S, S), bool), k=1)
        w = jnp.where(mask, -jnp.inf, w)
    w = w / math.sqrt(dim_head)
    w = jax.nn.softmax(w, axis=-1)
    o = jnp.einsum("bhqk,bhkd->bhqd", w, v)
    o = o.transpose(0, 2, 1, 3).reshape(B, S, E)
    return o @ params["w_out"] + params["b_out"]


if __name__ == "__main__":
    # Small shapes consistent with the module's (batch, seq, embed) forward.
    B, S = 2, 16
    num_heads, embed_dim = 4, 32

    key = jax.random.PRNGKey(0)
    k0, k1, k2, k3, k4 = jax.random.split(key, 5)

    bound = 1.0 / math.sqrt(embed_dim)
    w_in = jax.random.uniform(k0, (embed_dim, 3 * embed_dim), jnp.float32, -bound, bound)
    b_in = jax.random.uniform(k1, (3 * embed_dim,), jnp.float32, -bound, bound)
    w_out = jax.random.uniform(k2, (embed_dim, embed_dim), jnp.float32, -bound, bound)
    b_out = jax.random.uniform(k3, (embed_dim,), jnp.float32, -bound, bound)
    params = dict(w_in=w_in, b_in=b_in, w_out=w_out, b_out=b_out)

    x = jax.random.normal(k4, (B, S, embed_dim), jnp.float32)

    # Default path (mask=False in the PyTorch module).
    out = jax.block_until_ready(self_attention(x, params, num_heads=num_heads))
    ref = reference_self_attention(x, params, num_heads=num_heads)
    assert out.shape == (B, S, embed_dim)
    assert jnp.allclose(out, ref, atol=2e-3, rtol=2e-3), \
        float(jnp.max(jnp.abs(out - ref)))

    # Causal path (mask=True in the PyTorch module).
    out_c = jax.block_until_ready(
        self_attention(x, params, num_heads=num_heads, causal=True))
    ref_c = reference_self_attention(x, params, num_heads=num_heads, causal=True)
    assert jnp.allclose(out_c, ref_c, atol=2e-3, rtol=2e-3), \
        float(jnp.max(jnp.abs(out_c - ref_c)))

    print("KERNEL_OK")
</pallas_src>

<mosaic_0001>
module attributes {stable_mosaic.version = 11 : i64} {
  func.func @_self_attn_kernel(%arg0: i32, %arg1: memref<2x16x32xf32, #tpu.memory_space<vmem>>, %arg2: memref<32x96xf32, #tpu.memory_space<vmem>>, %arg3: memref<1x96xf32, #tpu.memory_space<vmem>>, %arg4: memref<32x128xf32, #tpu.memory_space<vmem>>, %arg5: memref<1x128xf32, #tpu.memory_space<vmem>>, %arg6: memref<2x16x128xf32, #tpu.memory_space<vmem>>) attributes {dimension_semantics = [#tpu.dimension_semantics<parallel>], iteration_bounds = array<i64: 1>, scalar_prefetch = 0 : i64, scratch_operands = 0 : i64, tpu.core_type = #tpu.core_type<tc>, window_params = [{transform_indices = @transform_0, window_bounds = array<i64: 2, 16, 32>}, {pipeline_mode = #tpu.pipeline_mode<synchronous>, transform_indices = @transform_1, window_bounds = array<i64: 32, 96>}, {pipeline_mode = #tpu.pipeline_mode<synchronous>, transform_indices = @transform_2, window_bounds = array<i64: 1, 96>}, {pipeline_mode = #tpu.pipeline_mode<synchronous>, transform_indices = @transform_3, window_bounds = array<i64: 32, 128>}, {pipeline_mode = #tpu.pipeline_mode<synchronous>, transform_indices = @transform_4, window_bounds = array<i64: 1, 128>}, {transform_indices = @transform_5, window_bounds = array<i64: 2, 16, 128>}]} {
    %c0 = arith.constant 0 : index
    %c0_0 = arith.constant 0 : index
    %c0_1 = arith.constant 0 : index
    %0 = vector.load %arg1[%c0, %c0_0, %c0_1] : memref<2x16x32xf32, #tpu.memory_space<vmem>>, vector<1x16x32xf32>
    %1 = vector.shape_cast %0 : vector<1x16x32xf32> to vector<16x32xf32>
    %c0_2 = arith.constant 0 : index
    %c0_3 = arith.constant 0 : index
    %2 = vector.load %arg2[%c0_2, %c0_3] : memref<32x96xf32, #tpu.memory_space<vmem>>, vector<32x96xf32>
    %cst = arith.constant dense<0.000000e+00> : vector<16x96xf32>
    %3 = tpu.matmul %1, %2, %cst {dimension_numbers = #tpu.dot_dimension_numbers<[1], [0], [0], [1], [0, 0, 1, 1], [], []>} : vector<16x32xf32>, vector<32x96xf32>, vector<16x96xf32> -> vector<16x96xf32>
    %c0_4 = arith.constant 0 : index
    %c0_5 = arith.constant 0 : index
    %4 = vector.load %arg3[%c0_4, %c0_5] : memref<1x96xf32, #tpu.memory_space<vmem>>, vector<1x96xf32>
    %5 = vector.broadcast %4 : vector<1x96xf32> to vector<16x96xf32>
    %6 = arith.addf %3, %5 : vector<16x96xf32>
    %7 = vector.extract_strided_slice %6 {offsets = [0, 0], sizes = [16, 32], strides = [1, 1]} : vector<16x96xf32> to vector<16x32xf32>
    %cst_6 = arith.constant 0.353553385 : f32
    %8 = vector.broadcast %cst_6 : f32 to vector<16x32xf32>
    %9 = arith.mulf %7, %8 : vector<16x32xf32>
    %10 = vector.extract_strided_slice %6 {offsets = [0, 32], sizes = [16, 32], strides = [1, 1]} : vector<16x96xf32> to vector<16x32xf32>
    %11 = vector.extract_strided_slice %6 {offsets = [0, 64], sizes = [16, 32], strides = [1, 1]} : vector<16x96xf32> to vector<16x32xf32>
    %12 = vector.extract_strided_slice %9 {offsets = [0, 0], sizes = [16, 8], strides = [1, 1]} : vector<16x32xf32> to vector<16x8xf32>
    %13 = vector.extract_strided_slice %10 {offsets = [0, 0], sizes = [16, 8], strides = [1, 1]} : vector<16x32xf32> to vector<16x8xf32>
    %14 = vector.extract_strided_slice %11 {offsets = [0, 0], sizes = [16, 8], strides = [1, 1]} : vector<16x32xf32> to vector<16x8xf32>
    %cst_7 = arith.constant dense<0.000000e+00> : vector<16x16xf32>
    %15 = tpu.matmul %12, %13, %cst_7 {dimension_numbers = #tpu.dot_dimension_numbers<[1], [1], [0], [0], [0, 0, 1, 0], [], []>} : vector<16x8xf32>, vector<16x8xf32>, vector<16x16xf32> -> vector<16x16xf32>
    %cst_8 = arith.constant dense<0xFF800000> : vector<16xf32>
    %16 = vector.multi_reduction <maximumf>, %15, %cst_8 [1] : vector<16x16xf32> to vector<16xf32>
    %17 = vector.shape_cast %16 : vector<16xf32> to vector<16x1xf32>
    %18 = vector.broadcast %17 : vector<16x1xf32> to vector<16x16xf32>
    %19 = arith.subf %15, %18 : vector<16x16xf32>
    %20 = math.exp %19 : vector<16x16xf32>
    %cst_9 = arith.constant dense<0.000000e+00> : vector<16xf32>
    %21 = vector.multi_reduction <add>, %20, %cst_9 [1] : vector<16x16xf32> to vector<16xf32>
    %22 = vector.shape_cast %21 : vector<16xf32> to vector<16x1xf32>
    %23 = tpu.reciprocal %22 : vector<16x1xf32> -> vector<16x1xf32>
    %24 = vector.broadcast %23 : vector<16x1xf32> to vector<16x16xf32>
    %25 = arith.mulf %20, %24 : vector<16x16xf32>
    %cst_10 = arith.constant dense<0.000000e+00> : vector<16x8xf32>
    %26 = tpu.matmul %25, %14, %cst_10 {dimension_numbers = #tpu.dot_dimension_numbers<[1], [0], [0], [1], [0, 0, 1, 1], [], []>} : vector<16x16xf32>, vector<16x8xf32>, vector<16x8xf32> -> vector<16x8xf32>
    %27 = vector.extract_strided_slice %9 {offsets = [0, 8], sizes = [16, 8], strides = [1, 1]} : vector<16x32xf32> to vector<16x8xf32>
    %28 = vector.extract_strided_slice %10 {offsets = [0, 8], sizes = [16, 8], strides = [1, 1]} : vector<16x32xf32> to vector<16x8xf32>
    %29 = vector.extract_strided_slice %11 {offsets = [0, 8], sizes = [16, 8], strides = [1, 1]} : vector<16x32xf32> to vector<16x8xf32>
    %cst_11 = arith.constant dense<0.000000e+00> : vector<16x16xf32>
    %30 = tpu.matmul %27, %28, %cst_11 {dimension_numbers = #tpu.dot_dimension_numbers<[1], [1], [0], [0], [0, 0, 1, 0], [], []>} : vector<16x8xf32>, vector<16x8xf32>, vector<16x16xf32> -> vector<16x16xf32>
    %cst_12 = arith.constant dense<0xFF800000> : vector<16xf32>
    %31 = vector.multi_reduction <maximumf>, %30, %cst_12 [1] : vector<16x16xf32> to vector<16xf32>
    %32 = vector.shape_cast %31 : vector<16xf32> to vector<16x1xf32>
    %33 = vector.broadcast %32 : vector<16x1xf32> to vector<16x16xf32>
    %34 = arith.subf %30, %33 : vector<16x16xf32>
    %35 = math.exp %34 : vector<16x16xf32>
    %cst_13 = arith.constant dense<0.000000e+00> : vector<16xf32>
    %36 = vector.multi_reduction <add>, %35, %cst_13 [1] : vector<16x16xf32> to vector<16xf32>
    %37 = vector.shape_cast %36 : vector<16xf32> to vector<16x1xf32>
    %38 = tpu.reciprocal %37 : vector<16x1xf32> -> vector<16x1xf32>
    %39 = vector.broadcast %38 : vector<16x1xf32> to vector<16x16xf32>
    %40 = arith.mulf %35, %39 : vector<16x16xf32>
    %cst_14 = arith.constant dense<0.000000e+00> : vector<16x8xf32>
    %41 = tpu.matmul %40, %29, %cst_14 {dimension_numbers = #tpu.dot_dimension_numbers<[1], [0], [0], [1], [0, 0, 1, 1], [], []>} : vector<16x16xf32>, vector<16x8xf32>, vector<16x8xf32> -> vector<16x8xf32>
    %42 = vector.extract_strided_slice %9 {offsets = [0, 16], sizes = [16, 8], strides = [1, 1]} : vector<16x32xf32> to vector<16x8xf32>
    %43 = vector.extract_strided_slice %10 {offsets = [0, 16], sizes = [16, 8], strides = [1, 1]} : vector<16x32xf32> to vector<16x8xf32>
    %44 = vector.extract_strided_slice %11 {offsets = [0, 16], sizes = [16, 8], strides = [1, 1]} : vector<16x32xf32> to vector<16x8xf32>
    %cst_15 = arith.constant dense<0.000000e+00> : vector<16x16xf32>
    %45 = tpu.matmul %42, %43, %cst_15 {dimension_numbers = #tpu.dot_dimension_numbers<[1], [1], [0], [0], [0, 0, 1, 0], [], []>} : vector<16x8xf32>, vector<16x8xf32>, vector<16x16xf32> -> vector<16x16xf32>
    %cst_16 = arith.constant dense<0xFF800000> : vector<16xf32>
    %46 = vector.multi_reduction <maximumf>, %45, %cst_16 [1] : vector<16x16xf32> to vector<16xf32>
    %47 = vector.shape_cast %46 : vector<16xf32> to vector<16x1xf32>
    %48 = vector.broadcast %47 : vector<16x1xf32> to vector<16x16xf32>
    %49 = arith.subf %45, %48 : vector<16x16xf32>
    %50 = math.exp %49 : vector<16x16xf32>
    %cst_17 = arith.constant dense<0.000000e+00> : vector<16xf32>
    %51 = vector.multi_reduction <add>, %50, %cst_17 [1] : vector<16x16xf32> to vector<16xf32>
    %52 = vector.shape_cast %51 : vector<16xf32> to vector<16x1xf32>
    %53 = tpu.reciprocal %52 : vector<16x1xf32> -> vector<16x1xf32>
    %54 = vector.broadcast %53 : vector<16x1xf32> to vector<16x16xf32>
    %55 = arith.mulf %50, %54 : vector<16x16xf32>
    %cst_18 = arith.constant dense<0.000000e+00> : vector<16x8xf32>
    %56 = tpu.matmul %55, %44, %cst_18 {dimension_numbers = #tpu.dot_dimension_numbers<[1], [0], [0], [1], [0, 0, 1, 1], [], []>} : vector<16x16xf32>, vector<16x8xf32>, vector<16x8xf32> -> vector<16x8xf32>
    %57 = vector.extract_strided_slice %9 {offsets = [0, 24], sizes = [16, 8], strides = [1, 1]} : vector<16x32xf32> to vector<16x8xf32>
    %58 = vector.extract_strided_slice %10 {offsets = [0, 24], sizes = [16, 8], strides = [1, 1]} : vector<16x32xf32> to vector<16x8xf32>
    %59 = vector.extract_strided_slice %11 {offsets = [0, 24], sizes = [16, 8], strides = [1, 1]} : vector<16x32xf32> to vector<16x8xf32>
    %cst_19 = arith.constant dense<0.000000e+00> : vector<16x16xf32>
    %60 = tpu.matmul %57, %58, %cst_19 {dimension_numbers = #tpu.dot_dimension_numbers<[1], [1], [0], [0], [0, 0, 1, 0], [], []>} : vector<16x8xf32>, vector<16x8xf32>, vector<16x16xf32> -> vector<16x16xf32>
    %cst_20 = arith.constant dense<0xFF800000> : vector<16xf32>
    %61 = vector.multi_reduction <maximumf>, %60, %cst_20 [1] : vector<16x16xf32> to vector<16xf32>
    %62 = vector.shape_cast %61 : vector<16xf32> to vector<16x1xf32>
    %63 = vector.broadcast %62 : vector<16x1xf32> to vector<16x16xf32>
    %64 = arith.subf %60, %63 : vector<16x16xf32>
    %65 = math.exp %64 : vector<16x16xf32>
    %cst_21 = arith.constant dense<0.000000e+00> : vector<16xf32>
    %66 = vector.multi_reduction <add>, %65, %cst_21 [1] : vector<16x16xf32> to vector<16xf32>
    %67 = vector.shape_cast %66 : vector<16xf32> to vector<16x1xf32>
    %68 = tpu.reciprocal %67 : vector<16x1xf32> -> vector<16x1xf32>
    %69 = vector.broadcast %68 : vector<16x1xf32> to vector<16x16xf32>
    %70 = arith.mulf %65, %69 : vector<16x16xf32>
    %cst_22 = arith.constant dense<0.000000e+00> : vector<16x8xf32>
    %71 = tpu.matmul %70, %59, %cst_22 {dimension_numbers = #tpu.dot_dimension_numbers<[1], [0], [0], [1], [0, 0, 1, 1], [], []>} : vector<16x16xf32>, vector<16x8xf32>, vector<16x8xf32> -> vector<16x8xf32>
    %72 = tpu.concatenate %26, %41, %56, %71 in 1 : vector<16x8xf32>, vector<16x8xf32>, vector<16x8xf32>, vector<16x8xf32> -> vector<16x32xf32>
    %c0_23 = arith.constant 0 : index
    %c0_24 = arith.constant 0 : index
    %73 = vector.load %arg4[%c0_23, %c0_24] : memref<32x128xf32, #tpu.memory_space<vmem>>, vector<32x128xf32>
    %cst_25 = arith.constant dense<0.000000e+00> : vector<16x128xf32>
    %74 = tpu.matmul %72, %73, %cst_25 {dimension_numbers = #tpu.dot_dimension_numbers<[1], [0], [0], [1], [0, 0, 1, 1], [], []>} : vector<16x32xf32>, vector<32x128xf32>, vector<16x128xf32> -> vector<16x128xf32>
    %c0_26 = arith.constant 0 : index
    %c0_27 = arith.constant 0 : index
    %75 = vector.load %arg5[%c0_26, %c0_27] : memref<1x128xf32, #tpu.memory_space<vmem>>, vector<1x128xf32>
    %76 = vector.broadcast %75 : vector<1x128xf32> to vector<16x128xf32>
    %77 = arith.addf %74, %76 : vector<16x128xf32>
    %c0_28 = arith.constant 0 : index
    %c0_29 = arith.constant 0 : index
    %c0_30 = arith.constant 0 : index
    %78 = vector.load %arg6[%c0_28, %c0_29, %c0_30] : memref<2x16x128xf32, #tpu.memory_space<vmem>>, vector<1x16x128xf32>
    %79 = vector.shape_cast %78 : vector<1x16x128xf32> to vector<16x128xf32>
    %80 = vector.shape_cast %77 : vector<16x128xf32> to vector<1x16x128xf32>
    tpu.vector_store %arg6[%c0_28, %c0_29, %c0_30], %80 {strides = array<i32>} : memref<2x16x128xf32, #tpu.memory_space<vmem>>, vector<1x16x128xf32>,
    %c1 = arith.constant 1 : index
    %c0_31 = arith.constant 0 : index
    %c0_32 = arith.constant 0 : index
    %81 = vector.load %arg1[%c1, %c0_31, %c0_32] : memref<2x16x32xf32, #tpu.memory_space<vmem>>, vector<1x16x32xf32>
    %82 = vector.shape_cast %81 : vector<1x16x32xf32> to vector<16x32xf32>
    %c0_33 = arith.constant 0 : index
    %c0_34 = arith.constant 0 : index
    %83 = vector.load %arg2[%c0_33, %c0_34] : memref<32x96xf32, #tpu.memory_space<vmem>>, vector<32x96xf32>
    %cst_35 = arith.constant dense<0.000000e+00> : vector<16x96xf32>
    %84 = tpu.matmul %82, %83, %cst_35 {dimension_numbers = #tpu.dot_dimension_numbers<[1], [0], [0], [1], [0, 0, 1, 1], [], []>} : vector<16x32xf32>, vector<32x96xf32>, vector<16x96xf32> -> vector<16x96xf32>
    %c0_36 = arith.constant 0 : index
    %c0_37 = arith.constant 0 : index
    %85 = vector.load %arg3[%c0_36, %c0_37] : memref<1x96xf32, #tpu.memory_space<vmem>>, vector<1x96xf32>
    %86 = vector.broadcast %85 : vector<1x96xf32> to vector<16x96xf32>
    %87 = arith.addf %84, %86 : vector<16x96xf32>
    %88 = vector.extract_strided_slice %87 {offsets = [0, 0], sizes = [16, 32], strides = [1, 1]} : vector<16x96xf32> to vector<16x32xf32>
    %cst_38 = arith.constant 0.353553385 : f32
    %89 = vector.broadcast %cst_38 : f32 to vector<16x32xf32>
    %90 = arith.mulf %88, %89 : vector<16x32xf32>
    %91 = vector.extract_strided_slice %87 {offsets = [0, 32], sizes = [16, 32], strides = [1, 1]} : vector<16x96xf32> to vector<16x32xf32>
    %92 = vector.extract_strided_slice %87 {offsets = [0, 64], sizes = [16, 32], strides = [1, 1]} : vector<16x96xf32> to vector<16x32xf32>
    %93 = vector.extract_strided_slice %90 {offsets = [0, 0], sizes = [16, 8], strides = [1, 1]} : vector<16x32xf32> to vector<16x8xf32>
    %94 = vector.extract_strided_slice %91 {offsets = [0, 0], sizes = [16, 8], strides = [1, 1]} : vector<16x32xf32> to vector<16x8xf32>
    %95 = vector.extract_strided_slice %92 {offsets = [0, 0], sizes = [16, 8], strides = [1, 1]} : vector<16x32xf32> to vector<16x8xf32>
    %cst_39 = arith.constant dense<0.000000e+00> : vector<16x16xf32>
    %96 = tpu.matmul %93, %94, %cst_39 {dimension_numbers = #tpu.dot_dimension_numbers<[1], [1], [0], [0], [0, 0, 1, 0], [], []>} : vector<16x8xf32>, vector<16x8xf32>, vector<16x16xf32> -> vector<16x16xf32>
    %cst_40 = arith.constant dense<0xFF800000> : vector<16xf32>
    %97 = vector.multi_reduction <maximumf>, %96, %cst_40 [1] : vector<16x16xf32> to vector<16xf32>
    %98 = vector.shape_cast %97 : vector<16xf32> to vector<16x1xf32>
    %99 = vector.broadcast %98 : vector<16x1xf32> to vector<16x16xf32>
    %100 = arith.subf %96, %99 : vector<16x16xf32>
    %101 = math.exp %100 : vector<16x16xf32>
    %cst_41 = arith.constant dense<0.000000e+00> : vector<16xf32>
    %102 = vector.multi_reduction <add>, %101, %cst_41 [1] : vector<16x16xf32> to vector<16xf32>
    %103 = vector.shape_cast %102 : vector<16xf32> to vector<16x1xf32>
    %104 = tpu.reciprocal %103 : vector<16x1xf32> -> vector<16x1xf32>
    %105 = vector.broadcast %104 : vector<16x1xf32> to vector<16x16xf32>
    %106 = arith.mulf %101, %105 : vector<16x16xf32>
    %cst_42 = arith.constant dense<0.000000e+00> : vector<16x8xf32>
    %107 = tpu.matmul %106, %95, %cst_42 {dimension_numbers = #tpu.dot_dimension_numbers<[1], [0], [0], [1], [0, 0, 1, 1], [], []>} : vector<16x16xf32>, vector<16x8xf32>, vector<16x8xf32> -> vector<16x8xf32>
    %108 = vector.extract_strided_slice %90 {offsets = [0, 8], sizes = [16, 8], strides = [1, 1]} : vector<16x32xf32> to vector<16x8xf32>
    %109 = vector.extract_strided_slice %91 {offsets = [0, 8], sizes = [16, 8], strides = [1, 1]} : vector<16x32xf32> to vector<16x8xf32>
    %110 = vector.extract_strided_slice %92 {offsets = [0, 8], sizes = [16, 8], strides = [1, 1]} : vector<16x32xf32> to vector<16x8xf32>
    %cst_43 = arith.constant dense<0.000000e+00> : vector<16x16xf32>
    %111 = tpu.matmul %108, %109, %cst_43 {dimension_numbers = #tpu.dot_dimension_numbers<[1], [1], [0], [0], [0, 0, 1, 0], [], []>} : vector<16x8xf32>, vector<16x8xf32>, vector<16x16xf32> -> vector<16x16xf32>
    %cst_44 = arith.constant dense<0xFF800000> : vector<16xf32>
    %112 = vector.multi_reduction <maximumf>, %111, %cst_44 [1] : vector<16x16xf32> to vector<16xf32>
    %113 = vector.shape_cast %112 : vector<16xf32> to vector<16x1xf32>
    %114 = vector.broadcast %113 : vector<16x1xf32> to vector<16x16xf32>
    %115 = arith.subf %111, %114 : vector<16x16xf32>
    %116 = math.exp %115 : vector<16x16xf32>
    %cst_45 = arith.constant dense<0.000000e+00> : vector<16xf32>
    %117 = vector.multi_reduction <add>, %116, %cst_45 [1] : vector<16x16xf32> to vector<16xf32>
    %118 = vector.shape_cast %117 : vector<16xf32> to vector<16x1xf32>
    %119 = tpu.reciprocal %118 : vector<16x1xf32> -> vector<16x1xf32>
    %120 = vector.broadcast %119 : vector<16x1xf32> to vector<16x16xf32>
    %121 = arith.mulf %116, %120 : vector<16x16xf32>
    %cst_46 = arith.constant dense<0.000000e+00> : vector<16x8xf32>
    %122 = tpu.matmul %121, %110, %cst_46 {dimension_numbers = #tpu.dot_dimension_numbers<[1], [0], [0], [1], [0, 0, 1, 1], [], []>} : vector<16x16xf32>, vector<16x8xf32>, vector<16x8xf32> -> vector<16x8xf32>
    %123 = vector.extract_strided_slice %90 {offsets = [0, 16], sizes = [16, 8], strides = [1, 1]} : vector<16x32xf32> to vector<16x8xf32>
    %124 = vector.extract_strided_slice %91 {offsets = [0, 16], sizes = [16, 8], strides = [1, 1]} : vector<16x32xf32> to vector<16x8xf32>
    %125 = vector.extract_strided_slice %92 {offsets = [0, 16], sizes = [16, 8], strides = [1, 1]} : vector<16x32xf32> to vector<16x8xf32>
    %cst_47 = arith.constant dense<0.000000e+00> : vector<16x16xf32>
    %126 = tpu.matmul %123, %124, %cst_47 {dimension_numbers = #tpu.dot_dimension_numbers<[1], [1], [0], [0], [0, 0, 1, 0], [], []>} : vector<16x8xf32>, vector<16x8xf32>, vector<16x16xf32> -> vector<16x16xf32>
    %cst_48 = arith.constant dense<0xFF800000> : vector<16xf32>
    %127 = vector.multi_reduction <maximumf>, %126, %cst_48 [1] : vector<16x16xf32> to vector<16xf32>
    %128 = vector.shape_cast %127 : vector<16xf32> to vector<16x1xf32>
    %129 = vector.broadcast %128 : vector<16x1xf32> to vector<16x16xf32>
    %130 = arith.subf %126, %129 : vector<16x16xf32>
    %131 = math.exp %130 : vector<16x16xf32>
    %cst_49 = arith.constant dense<0.000000e+00> : vector<16xf32>
    %132 = vector.multi_reduction <add>, %131, %cst_49 [1] : vector<16x16xf32> to vector<16xf32>
    %133 = vector.shape_cast %132 : vector<16xf32> to vector<16x1xf32>
    %134 = tpu.reciprocal %133 : vector<16x1xf32> -> vector<16x1xf32>
    %135 = vector.broadcast %134 : vector<16x1xf32> to vector<16x16xf32>
    %136 = arith.mulf %131, %135 : vector<16x16xf32>
    %cst_50 = arith.constant dense<0.000000e+00> : vector<16x8xf32>
    %137 = tpu.matmul %136, %125, %cst_50 {dimension_numbers = #tpu.dot_dimension_numbers<[1], [0], [0], [1], [0, 0, 1, 1], [], []>} : vector<16x16xf32>, vector<16x8xf32>, vector<16x8xf32> -> vector<16x8xf32>
    %138 = vector.extract_strided_slice %90 {offsets = [0, 24], sizes = [16, 8], strides = [1, 1]} : vector<16x32xf32> to vector<16x8xf32>
    %139 = vector.extract_strided_slice %91 {offsets = [0, 24], sizes = [16, 8], strides = [1, 1]} : vector<16x32xf32> to vector<16x8xf32>
    %140 = vector.extract_strided_slice %92 {offsets = [0, 24], sizes = [16, 8], strides = [1, 1]} : vector<16x32xf32> to vector<16x8xf32>
    %cst_51 = arith.constant dense<0.000000e+00> : vector<16x16xf32>
    %141 = tpu.matmul %138, %139, %cst_51 {dimension_numbers = #tpu.dot_dimension_numbers<[1], [1], [0], [0], [0, 0, 1, 0], [], []>} : vector<16x8xf32>, vector<16x8xf32>, vector<16x16xf32> -> vector<16x16xf32>
    %cst_52 = arith.constant dense<0xFF800000> : vector<16xf32>
    %142 = vector.multi_reduction <maximumf>, %141, %cst_52 [1] : vector<16x16xf32> to vector<16xf32>
    %143 = vector.shape_cast %142 : vector<16xf32> to vector<16x1xf32>
    %144 = vector.broadcast %143 : vector<16x1xf32> to vector<16x16xf32>
    %145 = arith.subf %141, %144 : vector<16x16xf32>
    %146 = math.exp %145 : vector<16x16xf32>
    %cst_53 = arith.constant dense<0.000000e+00> : vector<16xf32>
    %147 = vector.multi_reduction <add>, %146, %cst_53 [1] : vector<16x16xf32> to vector<16xf32>
    %148 = vector.shape_cast %147 : vector<16xf32> to vector<16x1xf32>
    %149 = tpu.reciprocal %148 : vector<16x1xf32> -> vector<16x1xf32>
    %150 = vector.broadcast %149 : vector<16x1xf32> to vector<16x16xf32>
    %151 = arith.mulf %146, %150 : vector<16x16xf32>
    %cst_54 = arith.constant dense<0.000000e+00> : vector<16x8xf32>
    %152 = tpu.matmul %151, %140, %cst_54 {dimension_numbers = #tpu.dot_dimension_numbers<[1], [0], [0], [1], [0, 0, 1, 1], [], []>} : vector<16x16xf32>, vector<16x8xf32>, vector<16x8xf32> -> vector<16x8xf32>
    %153 = tpu.concatenate %107, %122, %137, %152 in 1 : vector<16x8xf32>, vector<16x8xf32>, vector<16x8xf32>, vector<16x8xf32> -> vector<16x32xf32>
    %c0_55 = arith.constant 0 : index
    %c0_56 = arith.constant 0 : index
    %154 = vector.load %arg4[%c0_55, %c0_56] : memref<32x128xf32, #tpu.memory_space<vmem>>, vector<32x128xf32>
    %cst_57 = arith.constant dense<0.000000e+00> : vector<16x128xf32>
    %155 = tpu.matmul %153, %154, %cst_57 {dimension_numbers = #tpu.dot_dimension_numbers<[1], [0], [0], [1], [0, 0, 1, 1], [], []>} : vector<16x32xf32>, vector<32x128xf32>, vector<16x128xf32> -> vector<16x128xf32>
    %c0_58 = arith.constant 0 : index
    %c0_59 = arith.constant 0 : index
    %156 = vector.load %arg5[%c0_58, %c0_59] : memref<1x128xf32, #tpu.memory_space<vmem>>, vector<1x128xf32>
    %157 = vector.broadcast %156 : vector<1x128xf32> to vector<16x128xf32>
    %158 = arith.addf %155, %157 : vector<16x128xf32>
    %c1_60 = arith.constant 1 : index
    %c0_61 = arith.constant 0 : index
    %c0_62 = arith.constant 0 : index
    %159 = vector.load %arg6[%c1_60, %c0_61, %c0_62] : memref<2x16x128xf32, #tpu.memory_space<vmem>>, vector<1x16x128xf32>
    %160 = vector.shape_cast %159 : vector<1x16x128xf32> to vector<16x128xf32>
    %161 = vector.shape_cast %158 : vector<16x128xf32> to vector<1x16x128xf32>
    tpu.vector_store %arg6[%c1_60, %c0_61, %c0_62], %161 {strides = array<i32>} : memref<2x16x128xf32, #tpu.memory_space<vmem>>, vector<1x16x128xf32>,
    return
  }
  func.func @transform_0(%arg0: i32) -> (i32, i32, i32) {
    %c0_i32 = arith.constant 0 : i32
    %c0_i32_0 = arith.constant 0 : i32
    %c0_i32_1 = arith.constant 0 : i32
    return %arg0, %c0_i32, %c0_i32_0 : i32, i32, i32
  }
  func.func @transform_1(%arg0: i32) -> (i32, i32) {
    %c0_i32 = arith.constant 0 : i32
    %c0_i32_0 = arith.constant 0 : i32
    %c0_i32_1 = arith.constant 0 : i32
    return %c0_i32, %c0_i32_0 : i32, i32
  }
  func.func @transform_2(%arg0: i32) -> (i32, i32) {
    %c0_i32 = arith.constant 0 : i32
    %c0_i32_0 = arith.constant 0 : i32
    %c0_i32_1 = arith.constant 0 : i32
    return %c0_i32, %c0_i32_0 : i32, i32
  }
  func.func @transform_3(%arg0: i32) -> (i32, i32) {
    %c0_i32 = arith.constant 0 : i32
    %c0_i32_0 = arith.constant 0 : i32
    %c0_i32_1 = arith.constant 0 : i32
    return %c0_i32, %c0_i32_0 : i32, i32
  }
  func.func @transform_4(%arg0: i32) -> (i32, i32) {
    %c0_i32 = arith.constant 0 : i32
    %c0_i32_0 = arith.constant 0 : i32
    %c0_i32_1 = arith.constant 0 : i32
    return %c0_i32, %c0_i32_0 : i32, i32
  }
  func.func @transform_5(%arg0: i32) -> (i32, i32, i32) {
    %c0_i32 = arith.constant 0 : i32
    %c0_i32_0 = arith.constant 0 : i32
    %c0_i32_1 = arith.constant 0 : i32
    return %arg0, %c0_i32, %c0_i32_0 : i32, i32, i32
  }
}

</mosaic_0001>

<bundles_post_ra>
// kernel: tpu_custom_call.1
= control target key start
LH: loop header
LB: loop body
LE: loop exit
PB: predicated region body
PF: predicated region fallthrough
CT: control target
= control target key end

     0   :  { %10 = vsyncpa [#allocation3], 0  ;;  %s3187_s0 = inlined_call_operand.hbm [shape: f32[2,16,32], index: 0, kind: input, shape index: {}]   ;;  %s3188_s1 = inlined_call_operand.hbm [shape: f32[32,96], index: 1, kind: input, shape index: {}]   ;;  %s3189_s2 = inlined_call_operand.vmem [shape: f32[1,96], index: 2, kind: input, shape index: {}]   ;;  %s3190_s3 = inlined_call_operand.hbm [shape: f32[32,128], index: 3, kind: input, shape index: {}]   ;;  %s3191_s4 = inlined_call_operand.vmem [shape: f32[1,128], index: 4, kind: input, shape index: {}]   ;;  %s3192_s5 = inlined_call_operand.hbm [shape: f32[2,16,128], index: 5, kind: output, shape index: {}]  }
   0x1   :  { %11 = vsyncpa [#allocation6], 0 }
   0x2   :  { %12 = vsyncpa [#allocation4], 0  ;;  %s2799_s18 = smov [#allocation5]   ;;  %s2800_s20 = smov [#allocation2]  }
   0x3   :  { %s30_s19 = sshll.u32 %s2799_s18, 4  ;;  %s18_s21 = sshll.u32 %s2800_s20, 4  ;;  %s31_s19 = int_to_ptr.vmem [resolvable:$true] %s30_s19  ;;  %s2848_s21 = int_to_ptr.vmem [resolvable:$true] %s18_s21 }
   0x4   :  { %s2705_s24 = scalar_lea.hbm %s3188_s1, 512 }
   0x5   :  { %p2706_p0 = scmp.ne.s32.totalorder %s3188_s1, %s2705_s24  ;;  %p2709_p1 = scmp.lt.u32.totalorder %s2705_s24, %s3188_s1 }
   0x7   :  { %p2711_p2 = pnand %p2709_p1, %p2706_p0 }
   0x9   :  { %2714 = shalt.err (!%p2711_p2)
}
   0xa   :  { %s2715_s29 = scalar_lea.vmem %s31_s19, 512  ;;  %p2720_p4 = scmp.lt.s32.totalorder %s31_s19, %s31_s19 }
   0xb   :  { %p2716_p3 = scmp.ne.s32.totalorder %s31_s19, %s2715_s29  ;;  %p2721_p5 = scmp.lt.s32.totalorder %s2715_s29, %s2715_s29 }
   0xd   :  { %p2722_p6 = por %p2721_p5, %p2720_p4 }
   0xf   :  { %p2723_p7 = pnand %p2722_p6, %p2716_p3 }
  0x11   :  { %2726 = shalt.err (!%p2723_p7)
}
  0x12   :  { %s2801_s30 = smov 128   ;;  %s2802_s6 = smov 8  }
  0x13   :  { %36 = dma.hbm_to_vmem [thread:$0]  %s3188_s1, 512, %s31_s19, [#allocation6], %s2801_s30, %s2801_s30, %s2802_s6  }
  0x14   :  { %s2727_s11 = scalar_lea.hbm %s3187_s0, 512 }
  0x15   :  { %p2728_p8 = scmp.ne.s32.totalorder %s3187_s0, %s2727_s11  ;;  %p2731_p9 = scmp.lt.u32.totalorder %s2727_s11, %s3187_s0 }
  0x17   :  { %p2733_p10 = pnand %p2731_p9, %p2728_p8 }
  0x19   :  { %2736 = shalt.err (!%p2733_p10)
}
  0x1a   :  { %s2737_s16 = scalar_lea.vmem %s2848_s21, 512  ;;  %p2742_p12 = scmp.lt.s32.totalorder %s2848_s21, %s2848_s21 }
  0x1b   :  { %p2738_p11 = scmp.ne.s32.totalorder %s2848_s21, %s2737_s16  ;;  %p2743_p13 = scmp.lt.s32.totalorder %s2737_s16, %s2737_s16 }
  0x1d   :  { %p2744_p0 = por %p2743_p13, %p2742_p12 }
  0x1f   :  { %p2745_p1 = pnand %p2744_p0, %p2738_p11 }
  0x21   :  { %2748 = shalt.err (!%p2745_p1)
}
  0x22   :  { %24 = dma.hbm_to_vmem [thread:$0]  %s3187_s0, 512, %s2848_s21, [#allocation3], %s2801_s30, %s2801_s30, %s2802_s6  }
  0x23   :  { %s2803_s18 = smov [#allocation7]   ;;  %s2749_s23 = scalar_lea.hbm %s3190_s3, 512 }
  0x24   :  { %s44_s19 = sshll.u32 %s2803_s18, 4  ;;  %p2750_p2 = scmp.ne.s32.totalorder %s3190_s3, %s2749_s23  ;;  %s45_s19 = int_to_ptr.vmem [resolvable:$true] %s44_s19 }
  0x25   :  { %p2753_p3 = scmp.lt.u32.totalorder %s2749_s23, %s3190_s3 }
  0x27   :  { %p2755_p4 = pnand %p2753_p3, %p2750_p2 }
  0x29   :  { %2758 = shalt.err (!%p2755_p4)
}
  0x2a   :  { %s2759_s28 = scalar_lea.vmem %s45_s19, 512  ;;  %p2764_p6 = scmp.lt.s32.totalorder %s45_s19, %s45_s19 }
  0x2b   :  { %p2760_p5 = scmp.ne.s32.totalorder %s45_s19, %s2759_s28  ;;  %p2765_p7 = scmp.lt.s32.totalorder %s2759_s28, %s2759_s28 }
  0x2d   :  { %p2766_p8 = por %p2765_p7, %p2764_p6 }
  0x2f   :  { %p2767_p9 = pnand %p2766_p8, %p2760_p5 }
  0x31   :  { %2770 = shalt.err (!%p2767_p9)
}
  0x32   :  { %50 = dma.hbm_to_vmem [thread:$0]  %s3190_s3, 512, %s45_s19, [#allocation6], %s2801_s30, %s2801_s30, %s2802_s6  }
  0x33   :  { %2793 = dma.done.wait [#allocation3], 512  }
  0x34   :  { %2794 = vsyncadd [#allocation3], 4294966784 }
  0x35   :  { %2795 = dma.done.wait [#allocation6], 1024  }
  0x36   :  { %2796 = vsyncadd [#allocation6], 4294966272  ;;  %vm75_vm0 = vcmask 261120   ;;  %v64_v0 = vld [vmem:[#allocation5] sm:$0xff]  ;;  %v65_v1 = vld [vmem:[#allocation5 + $0x8] sm:$0xff]  ;;  %vm165_vm1 = vcmask 64512  }
  0x37   :  { %v66_v2 = vld [vmem:[#allocation5 + $0x10] sm:$0xff]  ;;  %v2900_v3 = vpack.c.bf16 %v65_v1, %v64_v0  ;;  %v67_v4 = vld [vmem:[#allocation5 + $0x18] sm:$0xff]  ;;  %v62_v5 = vld [vmem:[#allocation2] sm:$0xff]  ;;  %s2804_s7 = smov 96   ;;  %vm251_vm3 = vcmask 130048   ;;  %s2806_s8 = smov 88  }
  0x38   :  { %v2902_v6 = vpack.c.bf16 %v67_v4, %v66_v2  ;;  %2282 = vmatprep.mubr.msk.f32.mxu0 %vm75_vm0, %v62_v5  ;;  %v63_v7 = vld [vmem:[#allocation2 + $0x8] sm:$0xff]  ;;  %v2913_v8 = vld [vmem:[%s3189_s2] ss:$0 sm:$0xff]  ;;  %vm2927_vm2 = vmpackc.low %vm165_vm1, %vm165_vm1  ;;  %s2805_s2 = smov 64   ;;  %s2807_s9 = smov 120   ;;  %vm989_vm4 = vcmask 195584  }
  0x39   :  { %2431 = vmatprep.subr.bf16.mxu0 %v2900_v3  ;;  %s2808_s10 = smov 56   ;;  %s2809_s11 = smov 80  }
  0x3a   :  { %2433 = vmatpush3.bf16.msra.mxu0 %v2900_v3  ;;  %s2810_s12 = smov 112   ;;  %s2811_s13 = smov 72  }
  0x3b   :  { %2435 = vmatprep.subr.bf16.mxu0 %v2902_v6  ;;  %s2812_s14 = smov 104   ;;  %s2813_s15 = smov 48  }
  0x3c   :  { %s2814_s16 = smov 40   ;;  %s2815_s1 = smov 16  }
  0x3d   :  { %s2816_s17 = smov 24  }
  0x3e   :  { %2437 = vmatpush3.bf16.msra.mxu0 %v2902_v6 }
  0x41   :  { %2283 = vmatmul.mubr.msk.f32.vlgmr.msra.gmra.mrb[0].mxu0 %vm75_vm0, %v63_v7 }
 0x114   :  { %v2284_v9 = vpop.f32.mrb[0].mxu0 }
 0x115   :  { %v154_v10 = vadd.f32 %v2284_v9, %v2913_v8  ;;  %v148_v11 = vpop.f32.mrb[1].mxu0 }
 0x116   :  { %v149_v12 = vadd.f32 %v2913_v8, %v148_v11 }
 0x117   :  { %v2935_v20 = vmul.f32 0.35355338, %v154_v10 }
 0x118   :  { %v2917_v13 = vpack.i.bf16 %v154_v10, %v149_v12  ;;  %v2919_v14 = vmul.f32 0.35355338, %v149_v12 }
 0x11a   :  { %2562 = vrot.lane.b32.xlu0 %v2917_v13, %s2804_s7  ;;  %2289 = vmatprep.mubr.msk.f32.mxu1 %vm165_vm1, %v2919_v14 }
 0x18c   :  { %v2563_v15 = vpop.permute.xlu0 %2562 }
 0x18d   :  { %v2565_v16 = vunpack.i.h.bf16 %v2563_v15  ;;  %v2564_v17 = vunpack.i.l.bf16 %v2563_v15 }
 0x18f   :  { %v2438_v19 = vpack.c.bf16 %v2565_v16, %v2564_v17 }
 0x191   :  { %2440 = vmatprep.subr.msk.bf16.mxu1 %vm2927_vm2, %v2438_v19 }
 0x192   :  { %2443 = vmatpush3.bf16.xpose.msk.msra.mxu1 %vm2927_vm2, %v2438_v19 }
 0x199   :  { %2290 = vmatmul.mubr.msk.f32.vlgmr.msra.gmra.mrb[0].mxu1 %vm165_vm1, %v2935_v20 }
 0x26c   :  { %v2291_v21 = vpop.f32.mrb[0].mxu1 }
 0x26d   :  { %v242_v22 = vpop.f32.mrb[1].mxu1  ;;  %v255_v23 = vsel %vm251_vm3, %v2291_v21, -inf }
 0x26e   :  { %256 = vmax.xlane.f32.xlu1 %v255_v23  ;;  %v252_v24 = vsel %vm251_vm3, %v242_v22, -inf }
 0x26f   :  { %253 = vmax.xlane.f32.xlu0 %v252_v24 }
 0x27f   :  { %2567 = vrot.lane.b32.xlu1 %v2917_v13, %s2805_s2 }
 0x283   :  { %2572 = vrot.lane.b32.xlu1 %v2917_v13, %s2806_s8 }
 0x285   :  { %363 = vrot.lane.b32.xlu0 %v2935_v20, %s2807_s9 }
 0x2fb   :  { %v257_v25 = vpop.xlane.xlu1 %256 }
 0x2fc   :  { %v259_v26 = vsub.f32 %v2291_v21, %v257_v25  ;;  %v254_v27 = vpop.xlane.xlu0 %253 }
 0x2fd   :  { %v258_v28 = vsub.f32 %v242_v22, %v254_v27 }
 0x2fe   :  { %v262_v29 = vmul.f32 1.442695, %v259_v26 }
 0x2ff   :  { %v260_v30 = vmul.f32 1.442695, %v258_v28  ;;  %v2568_v31 = vpop.permute.xlu1 %2567 }
 0x300   :  { %2641 = vpow2.f32 %v262_v29  ;;  %v2570_v32 = vunpack.i.h.bf16 %v2568_v31  ;;  %v2569_v33 = vunpack.i.l.bf16 %v2568_v31  ;;  %v364_v50 = vpop.permute.xlu0 %363 }
 0x301   :  { %2643 = vpow2.f32 %v260_v30 }
 0x302   :  { %v2444_v34 = vpack.c.bf16 %v2570_v32, %v2569_v33 }
 0x303   :  { %v2573_v35 = vpop.permute.xlu1 %2572 }
 0x304   :  { %v2575_v36 = vunpack.i.h.bf16 %v2573_v35  ;;  %v2574_v37 = vunpack.i.l.bf16 %v2573_v35  ;;  %2445 = vmatprep.subr.bf16.mxu1 %v2444_v34 }
 0x305   :  { %2447 = vmatpush3.bf16.msra.mxu1 %v2444_v34 }
 0x306   :  { %v2448_v38 = vpack.c.bf16 %v2575_v36, %v2574_v37 }
 0x308   :  { %2450 = vmatprep.subr.msk.bf16.mxu1 %vm2927_vm2, %v2448_v38 }
 0x30a   :  { %v2642_v39 = vpop.eup %2641 }
 0x30b   :  { %v267_v40 = vsel %vm251_vm3, %v2642_v39, 0.0  ;;  %v2644_v41 = vpop.eup %2643 }
 0x30c   :  { %268 = vadd.xlane.f32.xlu1 %v267_v40  ;;  %v264_v42 = vsel %vm251_vm3, %v2644_v41, 0.0 }
 0x310   :  { %265 = vadd.xlane.f32.xlu1 %v264_v42 }
 0x321   :  { %361 = vrot.lane.b32.xlu1 %v2919_v14, %s2807_s9 }
 0x399   :  { %v269_v43 = vpop.xlane.xlu1 %268 }
 0x39a   :  { %2645 = vrcp.f32 %v269_v43 }
 0x39d   :  { %v266_v44 = vpop.xlane.xlu1 %265 }
 0x39e   :  { %2647 = vrcp.f32 %v266_v44 }
 0x3a1   :  { %v362_v49 = vpop.permute.xlu1 %361 }
 0x3a4   :  { %v2646_v45 = vpop.eup %2645 }
 0x3a5   :  { %v273_v48 = vmul.f32 %v2646_v45, %v2642_v39 }
 0x3a8   :  { %v2648_v46 = vpop.eup %2647 }
 0x3a9   :  { %v272_v47 = vmul.f32 %v2648_v46, %v2644_v41 }
 0x3ab   :  { %2296 = vmatprep.mubr.msk.f32.mxu1 %vm251_vm3, %v272_v47 }
 0x3ac   :  { %2297 = vmatmul.mubr.msk.f32.vlgmr.msra.gmra.mrb[2].mxu1 %vm251_vm3, %v273_v48 }
 0x3ad   :  { %2453 = vmatpush3.bf16.xpose.msk.msra.mxu1 %vm2927_vm2, %v2448_v38  ;;  %2303 = vmatprep.mubr.msk.f32.mxu1 %vm165_vm1, %v362_v49 }
 0x3b4   :  { %2304 = vmatmul.mubr.msk.f32.vlgmr.msra.gmra.mrb[4].mxu1 %vm165_vm1, %v364_v50 }
 0x47f   :  { %v2959_v51 = vpop.f32.mrb[2].mxu1 }
 0x480   :  { %v2961_v52 = vpop.f32.mrb[3].mxu1 }
 0x487   :  { %v2305_v53 = vpop.f32.mrb[4].mxu1 }
 0x488   :  { %v443_v54 = vpop.f32.mrb[5].mxu1  ;;  %v455_v55 = vsel %vm251_vm3, %v2305_v53, -inf }
 0x489   :  { %456 = vmax.xlane.f32.xlu0 %v455_v55  ;;  %v452_v56 = vsel %vm251_vm3, %v443_v54, -inf }
 0x48a   :  { %453 = vmax.xlane.f32.xlu1 %v452_v56 }
 0x49b   :  { %2577 = vrot.lane.b32.xlu1 %v2917_v13, %s2808_s10 }
 0x49f   :  { %2582 = vrot.lane.b32.xlu0 %v2917_v13, %s2809_s11  ;;  %561 = vrot.lane.b32.xlu1 %v2919_v14, %s2810_s12 }
 0x516   :  { %v457_v57 = vpop.xlane.xlu0 %456 }
 0x517   :  { %v459_v58 = vsub.f32 %v2305_v53, %v457_v57  ;;  %v454_v59 = vpop.xlane.xlu1 %453 }
 0x518   :  { %v458_v60 = vsub.f32 %v443_v54, %v454_v59 }
 0x519   :  { %v462_v61 = vmul.f32 1.442695, %v459_v58 }
 0x51a   :  { %v460_v62 = vmul.f32 1.442695, %v458_v60  ;;  %v2583_v63 = vpop.permute.xlu0 %2582 }
 0x51b   :  { %2649 = vpow2.f32 %v462_v61  ;;  %v2578_v0 = vpop.permute.xlu1 %2577  ;;  %v2585_v1 = vunpack.i.h.bf16 %v2583_v63  ;;  %v2584_v2 = vunpack.i.l.bf16 %v2583_v63 }
 0x51c   :  { %v2580_v4 = vunpack.i.h.bf16 %v2578_v0  ;;  %v2579_v5 = vunpack.i.l.bf16 %v2578_v0  ;;  %2651 = vpow2.f32 %v460_v62 }
 0x51d   :  { %v2458_v9 = vpack.c.bf16 %v2585_v1, %v2584_v2 }
 0x51e   :  { %v2454_v7 = vpack.c.bf16 %v2580_v4, %v2579_v5 }
 0x51f   :  { %v562_v16 = vpop.permute.xlu1 %561 }
 0x520   :  { %2455 = vmatprep.subr.bf16.mxu0 %v2454_v7 }
 0x521   :  { %2457 = vmatpush3.bf16.msra.mxu0 %v2454_v7 }
 0x522   :  { %2460 = vmatprep.subr.msk.bf16.mxu0 %vm2927_vm2, %v2458_v9 }
 0x525   :  { %v2650_v10 = vpop.eup %2649 }
 0x526   :  { %v467_v11 = vsel %vm251_vm3, %v2650_v10, 0.0  ;;  %v2652_v12 = vpop.eup %2651 }
 0x527   :  { %468 = vadd.xlane.f32.xlu1 %v467_v11  ;;  %v464_v15 = vsel %vm251_vm3, %v2652_v12, 0.0  ;;  %v1087_v11 = vld [vmem:[#allocation2 + $0x10] sm:$0xff] }
 0x52b   :  { %465 = vadd.xlane.f32.xlu1 %v464_v15 }
 0x53c   :  { %563 = vrot.lane.b32.xlu1 %v2935_v20, %s2810_s12 }
 0x5b4   :  { %v469_v17 = vpop.xlane.xlu1 %468 }
 0x5b5   :  { %2653 = vrcp.f32 %v469_v17 }
 0x5b8   :  { %v466_v19 = vpop.xlane.xlu1 %465 }
 0x5b9   :  { %2655 = vrcp.f32 %v466_v19 }
 0x5bc   :  { %v564_v25 = vpop.permute.xlu1 %563 }
 0x5bf   :  { %v2654_v21 = vpop.eup %2653 }
 0x5c0   :  { %v473_v24 = vmul.f32 %v2654_v21, %v2650_v10 }
 0x5c3   :  { %v2656_v22 = vpop.eup %2655 }
 0x5c4   :  { %v472_v23 = vmul.f32 %v2656_v22, %v2652_v12  ;;  %v1088_v12 = vld [vmem:[#allocation2 + $0x18] sm:$0xff] }
 0x5c6   :  { %2310 = vmatprep.mubr.msk.f32.mxu0 %vm251_vm3, %v472_v23 }
 0x5c7   :  { %2311 = vmatmul.mubr.msk.f32.vlgmr.msra.gmra.mrb[2].mxu0 %vm251_vm3, %v473_v24 }
 0x5c8   :  { %2463 = vmatpush3.bf16.xpose.msk.msra.mxu0 %vm2927_vm2, %v2458_v9  ;;  %2317 = vmatprep.mubr.msk.f32.mxu0 %vm165_vm1, %v562_v16 }
 0x5cf   :  { %2318 = vmatmul.mubr.msk.f32.vlgmr.msra.gmra.mrb[4].mxu0 %vm165_vm1, %v564_v25 }
 0x69a   :  { %v2983_v26 = vpop.f32.mrb[2].mxu0 }
 0x69b   :  { %v2985_v27 = vpop.f32.mrb[3].mxu0 }
 0x6a2   :  { %v2319_v28 = vpop.f32.mrb[4].mxu0 }
 0x6a3   :  { %v643_v29 = vpop.f32.mrb[5].mxu0  ;;  %v655_v30 = vsel %vm251_vm3, %v2319_v28, -inf }
 0x6a4   :  { %656 = vmax.xlane.f32.xlu0 %v655_v30  ;;  %v652_v31 = vsel %vm251_vm3, %v643_v29, -inf }
 0x6a5   :  { %653 = vmax.xlane.f32.xlu1 %v652_v31 }
 0x731   :  { %v657_v32 = vpop.xlane.xlu0 %656 }
 0x732   :  { %v659_v33 = vsub.f32 %v2319_v28, %v657_v32  ;;  %v654_v34 = vpop.xlane.xlu1 %653  ;;  %v992_v32 = vld [vmem:[#allocation7] sm:$0xff] }
 0x733   :  { %v658_v35 = vsub.f32 %v643_v29, %v654_v34  ;;  %v994_v34 = vld [vmem:[#allocation7 + $0x10] sm:$0xff] }
 0x734   :  { %v662_v36 = vmul.f32 1.442695, %v659_v33  ;;  %v993_v33 = vld [vmem:[#allocation7 + $0x8] sm:$0xff] }
 0x735   :  { %v660_v37 = vmul.f32 1.442695, %v658_v35  ;;  %v3035_v35 = vpack.c.bf16 %v993_v33, %v992_v32 }
 0x736   :  { %2657 = vpow2.f32 %v662_v36  ;;  %v995_v36 = vld [vmem:[#allocation7 + $0x18] sm:$0xff] }
 0x737   :  { %2659 = vpow2.f32 %v660_v37  ;;  %v3037_v37 = vpack.c.bf16 %v995_v36, %v994_v34 }
 0x740   :  { %v2658_v38 = vpop.eup %2657 }
 0x741   :  { %v2660_v39 = vpop.eup %2659  ;;  %v667_v40 = vsel %vm251_vm3, %v2658_v38, 0.0 }
 0x742   :  { %668 = vadd.xlane.f32.xlu1 %v667_v40  ;;  %v664_v41 = vsel %vm251_vm3, %v2660_v39, 0.0 }
 0x743   :  { %665 = vadd.xlane.f32.xlu0 %v664_v41 }
 0x753   :  { %2592 = vrot.lane.b32.xlu1 %v2917_v13, %s2811_s13 }
 0x757   :  { %761 = vrot.lane.b32.xlu1 %v2919_v14, %s2812_s14 }
 0x759   :  { %2587 = vrot.lane.b32.xlu0 %v2917_v13, %s2813_s15 }
 0x75d   :  { %763 = vrot.lane.b32.xlu0 %v2935_v20, %s2812_s14 }
 0x7cf   :  { %v669_v42 = vpop.xlane.xlu1 %668 }
 0x7d0   :  { %2661 = vrcp.f32 %v669_v42  ;;  %v666_v43 = vpop.xlane.xlu0 %665 }
 0x7d1   :  { %2663 = vrcp.f32 %v666_v43 }
 0x7d3   :  { %v2593_v44 = vpop.permute.xlu1 %2592 }
 0x7d4   :  { %v2588_v45 = vpop.permute.xlu0 %2587  ;;  %v2595_v46 = vunpack.i.h.bf16 %v2593_v44  ;;  %v2594_v47 = vunpack.i.l.bf16 %v2593_v44 }
 0x7d5   :  { %v2590_v48 = vunpack.i.h.bf16 %v2588_v45  ;;  %v2589_v49 = vunpack.i.l.bf16 %v2588_v45 }
 0x7d6   :  { %v2468_v53 = vpack.c.bf16 %v2595_v46, %v2594_v47 }
 0x7d7   :  { %v2464_v50 = vpack.c.bf16 %v2590_v48, %v2589_v49  ;;  %v762_v56 = vpop.permute.xlu1 %761 }
 0x7d8   :  { %v764_v57 = vpop.permute.xlu0 %763 }
 0x7d9   :  { %2465 = vmatprep.subr.bf16.mxu1 %v2464_v50 }
 0x7da   :  { %v2662_v14 = vpop.eup %2661  ;;  %2467 = vmatpush3.bf16.msra.mxu1 %v2464_v50 }
 0x7db   :  { %v2664_v54 = vpop.eup %2663  ;;  %2470 = vmatprep.subr.msk.bf16.mxu1 %vm2927_vm2, %v2468_v53  ;;  %v673_v55 = vmul.f32 %v2662_v14, %v2658_v38 }
 0x7dc   :  { %v672_v20 = vmul.f32 %v2664_v54, %v2660_v39 }
 0x7de   :  { %2324 = vmatprep.mubr.msk.f32.mxu1 %vm251_vm3, %v672_v20  ;;  %v3068_v20 = vld [vmem:[%s3191_s4] ss:$0 sm:$0xff]  ;;  %s2817_s4 = smov [#allocation8]  }
 0x7df   :  { %2325 = vmatmul.mubr.msk.f32.vlgmr.msra.gmra.mrb[6].mxu1 %vm251_vm3, %v673_v55  ;;  %s2113_s20 = sshll.u32 %s2817_s4, 4  ;;  %s2114_s20 = int_to_ptr.vmem [resolvable:$true] %s2113_s20 }
 0x7e0   :  { %2331 = vmatprep.mubr.msk.f32.mxu1 %vm165_vm1, %v762_v56  ;;  %s2771_s22 = scalar_lea.vmem %s2114_s20, 512  ;;  %p2776_p11 = scmp.lt.s32.totalorder %s2114_s20, %s2114_s20 }
 0x7e1   :  { %p2772_p10 = scmp.ne.s32.totalorder %s2114_s20, %s2771_s22  ;;  %p2777_p12 = scmp.lt.s32.totalorder %s2771_s22, %s2771_s22 }
 0x7e3   :  { %2473 = vmatpush3.bf16.xpose.msk.msra.mxu1 %vm2927_vm2, %v2468_v53  ;;  %p2778_p13 = por %p2777_p12, %p2776_p11 }
 0x7e4   :  { %2487 = vmatprep.subr.bf16.mxu1 %v2900_v3 }
 0x7e5   :  { %p2779_p0 = pnand %p2778_p13, %p2772_p10 }
 0x7ea   :  { %2332 = vmatmul.mubr.msk.f32.vlgmr.msra.gmra.mrb[8].mxu1 %vm165_vm1, %v764_v57 }
 0x7eb   :  { %2489 = vmatpush3.bf16.msra.mxu1 %v2900_v3  ;;  %2360 = vmatprep.mubr.msk.f32.mxu1 %vm75_vm0, %v1087_v11 }
 0x7ec   :  { %2491 = vmatprep.subr.bf16.mxu1 %v2902_v6 }
 0x7ef   :  { %2493 = vmatpush3.bf16.msra.mxu1 %v2902_v6 }
 0x7f2   :  { %2361 = vmatmul.mubr.msk.f32.vlgmr.msra.gmra.mrb[10].mxu1 %vm75_vm0, %v1088_v12 }
 0x8b2   :  { %v2326_v58 = vpop.f32.mrb[6].mxu1 }
 0x8b3   :  { %v752_v59 = vpop.f32.mrb[7].mxu1 }
 0x8bd   :  { %v2333_v60 = vpop.f32.mrb[8].mxu1 }
 0x8be   :  { %v843_v61 = vpop.f32.mrb[9].mxu1  ;;  %v855_v62 = vsel %vm251_vm3, %v2333_v60, -inf }
 0x8bf   :  { %856 = vmax.xlane.f32.xlu0 %v855_v62  ;;  %v852_v63 = vsel %vm251_vm3, %v843_v61, -inf }
 0x8c0   :  { %853 = vmax.xlane.f32.xlu1 %v852_v63 }
 0x8c5   :  { %v2362_v28 = vpop.f32.mrb[10].mxu1 }
 0x8c6   :  { %v1178_v29 = vadd.f32 %v2362_v28, %v2913_v8  ;;  %v1172_v30 = vpop.f32.mrb[11].mxu1 }
 0x94c   :  { %v857_v0 = vpop.xlane.xlu0 %856 }
 0x94d   :  { %v859_v1 = vsub.f32 %v2333_v60, %v857_v0  ;;  %v854_v2 = vpop.xlane.xlu1 %853 }
 0x94e   :  { %v858_v4 = vsub.f32 %v843_v61, %v854_v2 }
 0x94f   :  { %v862_v5 = vmul.f32 1.442695, %v859_v1 }
 0x950   :  { %v860_v3 = vmul.f32 1.442695, %v858_v4 }
 0x951   :  { %2665 = vpow2.f32 %v862_v5 }
 0x952   :  { %2667 = vpow2.f32 %v860_v3 }
 0x95b   :  { %v2666_v7 = vpop.eup %2665 }
 0x95c   :  { %v2668_v6 = vpop.eup %2667  ;;  %v867_v9 = vsel %vm251_vm3, %v2666_v7, 0.0 }
 0x95d   :  { %868 = vadd.xlane.f32.xlu1 %v867_v9  ;;  %v864_v10 = vsel %vm251_vm3, %v2668_v6, 0.0 }
 0x95e   :  { %865 = vadd.xlane.f32.xlu0 %v864_v10 }
 0x96e   :  { %963 = vrot.lane.b32.xlu1 %v2985_v27, %s2802_s6 }
 0x972   :  { %965 = vrot.lane.b32.xlu1 %v2983_v26, %s2802_s6 }
 0x974   :  { %2597 = vrot.lane.b32.xlu0 %v2917_v13, %s2814_s16 }
 0x978   :  { %971 = vrot.lane.b32.xlu0 %v752_v59, %s2815_s1 }
 0x97c   :  { %973 = vrot.lane.b32.xlu0 %v2326_v58, %s2815_s1 }
 0x9ea   :  { %v869_v15 = vpop.xlane.xlu1 %868 }
 0x9eb   :  { %2669 = vrcp.f32 %v869_v15  ;;  %v866_v16 = vpop.xlane.xlu0 %865 }
 0x9ec   :  { %2671 = vrcp.f32 %v866_v16 }
 0x9ee   :  { %v964_v17 = vpop.permute.xlu1 %963 }
 0x9ef   :  { %v985_v19 = vsel %vm165_vm1, %v2961_v52, %v964_v17  ;;  %v2598_v21 = vpop.permute.xlu0 %2597  ;;  %v1173_v52 = vadd.f32 %v2913_v8, %v1172_v30 }
 0x9f0   :  { %v2600_v22 = vunpack.i.h.bf16 %v2598_v21  ;;  %v2599_v23 = vunpack.i.l.bf16 %v2598_v21 }
 0x9f1   :  { %v3031_v31 = vpack.i.bf16 %v1178_v29, %v1173_v52  ;;  %v3054_v54 = vmul.f32 0.35355338, %v1173_v52 }
 0x9f2   :  { %v2474_v24 = vpack.c.bf16 %v2600_v22, %v2599_v23  ;;  %v966_v8 = vpop.permute.xlu1 %965 }
 0x9f3   :  { %2602 = vrot.lane.b32.xlu1 %v3031_v31, %s2804_s7  ;;  %v972_v44 = vpop.permute.xlu0 %971  ;;  %v986_v47 = vsel %vm165_vm1, %v2959_v51, %v966_v8  ;;  %v3061_v51 = vmul.f32 0.35355338, %v1178_v29 }
 0x9f4   :  { %2475 = vmatprep.subr.bf16.mxu0 %v2474_v24  ;;  %v987_v48 = vsel %vm251_vm3, %v985_v19, %v972_v44 }
 0x9f5   :  { %v2670_v25 = vpop.eup %2669  ;;  %2477 = vmatpush3.bf16.msra.mxu0 %v2474_v24 }
 0x9f6   :  { %v2672_v13 = vpop.eup %2671  ;;  %v873_v27 = vmul.f32 %v2670_v25, %v2666_v7  ;;  %2479 = vmatprep.subr.bf16.mxu0 %v3035_v35 }
 0x9f7   :  { %v872_v26 = vmul.f32 %v2672_v13, %v2668_v6  ;;  %v974_v45 = vpop.permute.xlu0 %973 }
 0x9f8   :  { %v988_v50 = vsel %vm251_vm3, %v986_v47, %v974_v45 }
 0x9f9   :  { %2338 = vmatprep.mubr.msk.f32.mxu0 %vm251_vm3, %v872_v26 }
 0x9fa   :  { %2339 = vmatmul.mubr.msk.f32.vlgmr.msra.gmra.mrb[6].mxu0 %vm251_vm3, %v873_v27 }
 0x9fb   :  { %2481 = vmatpush3.bf16.msra.mxu0 %v3035_v35 }
 0x9fc   :  { %2483 = vmatprep.subr.bf16.mxu0 %v3037_v37 }
 0x9ff   :  { %2485 = vmatpush3.bf16.msra.mxu0 %v3037_v37 }
 0xa65   :  { %v2603_v38 = vpop.permute.xlu1 %2602 }
 0xa66   :  { %v2605_v39 = vunpack.i.h.bf16 %v2603_v38  ;;  %v2604_v40 = vunpack.i.l.bf16 %v2603_v38 }
 0xa68   :  { %v2494_v41 = vpack.c.bf16 %v2605_v39, %v2604_v40 }
 0xa6a   :  { %2496 = vmatprep.subr.msk.bf16.mxu0 %vm2927_vm2, %v2494_v41 }
 0xacd   :  { %v2340_v42 = vpop.f32.mrb[6].mxu0 }
 0xace   :  { %981 = vrot.lane.b32.xlu0 %v2340_v42, %s2816_s17  ;;  %v952_v43 = vpop.f32.mrb[7].mxu0 }
 0xacf   :  { %979 = vrot.lane.b32.xlu1 %v952_v43, %s2816_s17 }
 0xb40   :  { %v982_v46 = vpop.permute.xlu0 %981 }
 0xb41   :  { %v980_v49 = vpop.permute.xlu1 %979  ;;  %v991_v14 = vsel %vm989_vm4, %v988_v50, %v982_v46 }
 0xb42   :  { %v990_v53 = vsel %vm989_vm4, %v987_v48, %v980_v49 }
 0xb43   :  { %2349 = vmatprep.mubr.msk.f32.mxu0 %vm75_vm0, %v990_v53 }
 0xb44   :  { %2350 = vmatmul.mubr.msk.f32.vlgmr.msra.gmra.mrb[8].mxu0 %vm75_vm0, %v991_v14 }
 0xb45   :  { %2499 = vmatpush3.bf16.xpose.msk.msra.mxu0 %vm2927_vm2, %v2494_v41  ;;  %2367 = vmatprep.mubr.msk.f32.mxu0 %vm165_vm1, %v3054_v54 }
 0xb4c   :  { %2368 = vmatmul.mubr.msk.f32.vlgmr.msra.gmra.mrb[10].mxu0 %vm165_vm1, %v3061_v51 }
 0xc17   :  { %v2351_v55 = vpop.f32.mrb[8].mxu0 }
 0xc18   :  { %v1081_v56 = vadd.f32 %v2351_v55, %v3068_v20  ;;  %v1075_v57 = vpop.f32.mrb[9].mxu0 }
 0xc19   :  { %v1076_v58 = vadd.f32 %v3068_v20, %v1075_v57 }
 0xc1a   :  { %1085 = vst [vmem:[#allocation8 + $0x8] sm:$0xff] %v1081_v56 }
 0xc1b   :  { %1084 = vst [vmem:[#allocation8] sm:$0xff] %v1076_v58 }
 0xc1f   :  { %v2369_v59 = vpop.f32.mrb[10].mxu0 }
 0xc20   :  { %v1265_v60 = vpop.f32.mrb[11].mxu0  ;;  %v1277_v61 = vsel %vm251_vm3, %v2369_v59, -inf }
 0xc21   :  { %1278 = vmax.xlane.f32.xlu0 %v1277_v61  ;;  %v1274_v62 = vsel %vm251_vm3, %v1265_v60, -inf }
 0xc22   :  { %1275 = vmax.xlane.f32.xlu1 %v1274_v62 }
 0xcae   :  { %v1279_v63 = vpop.xlane.xlu0 %1278 }
 0xcaf   :  { %v1281_v0 = vsub.f32 %v2369_v59, %v1279_v63  ;;  %v1276_v1 = vpop.xlane.xlu1 %1275 }
 0xcb0   :  { %v1280_v2 = vsub.f32 %v1265_v60, %v1276_v1 }
 0xcb1   :  { %v1284_v4 = vmul.f32 1.442695, %v1281_v0 }
 0xcb2   :  { %v1282_v5 = vmul.f32 1.442695, %v1280_v2 }
 0xcb3   :  { %2673 = vpow2.f32 %v1284_v4 }
 0xcb4   :  { %2675 = vpow2.f32 %v1282_v5 }
 0xcbd   :  { %v2674_v3 = vpop.eup %2673 }
 0xcbe   :  { %v2676_v7 = vpop.eup %2675  ;;  %v1289_v6 = vsel %vm251_vm3, %v2674_v3, 0.0 }
 0xcbf   :  { %1290 = vadd.xlane.f32.xlu1 %v1289_v6  ;;  %v1286_v9 = vsel %vm251_vm3, %v2676_v7, 0.0 }
 0xcc0   :  { %1287 = vadd.xlane.f32.xlu0 %v1286_v9 }
 0xcd0   :  { %2612 = vrot.lane.b32.xlu1 %v3031_v31, %s2806_s8 }
 0xcd4   :  { %1383 = vrot.lane.b32.xlu1 %v3054_v54, %s2807_s9 }
 0xcd6   :  { %2607 = vrot.lane.b32.xlu0 %v3031_v31, %s2805_s2 }
 0xcda   :  { %1385 = vrot.lane.b32.xlu0 %v3061_v51, %s2807_s9 }
 0xd4c   :  { %v1291_v10 = vpop.xlane.xlu1 %1290 }
 0xd4d   :  { %2677 = vrcp.f32 %v1291_v10  ;;  %v1288_v11 = vpop.xlane.xlu0 %1287 }
 0xd4e   :  { %2679 = vrcp.f32 %v1288_v11 }
 0xd50   :  { %v2613_v12 = vpop.permute.xlu1 %2612 }
 0xd51   :  { %v2608_v15 = vpop.permute.xlu0 %2607  ;;  %v2615_v16 = vunpack.i.h.bf16 %v2613_v12  ;;  %v2614_v17 = vunpack.i.l.bf16 %v2613_v12 }
 0xd52   :  { %v2610_v19 = vunpack.i.h.bf16 %v2608_v15  ;;  %v2609_v21 = vunpack.i.l.bf16 %v2608_v15 }
 0xd53   :  { %v2504_v23 = vpack.c.bf16 %v2615_v16, %v2614_v17 }
 0xd54   :  { %v2500_v22 = vpack.c.bf16 %v2610_v19, %v2609_v21  ;;  %v1384_v27 = vpop.permute.xlu1 %1383 }
 0xd55   :  { %v1386_v28 = vpop.permute.xlu0 %1385 }
 0xd56   :  { %2501 = vmatprep.subr.bf16.mxu1 %v2500_v22 }
 0xd57   :  { %v2678_v24 = vpop.eup %2677  ;;  %2503 = vmatpush3.bf16.msra.mxu1 %v2500_v22 }
 0xd58   :  { %v2680_v25 = vpop.eup %2679  ;;  %2506 = vmatprep.subr.msk.bf16.mxu1 %vm2927_vm2, %v2504_v23  ;;  %v1295_v26 = vmul.f32 %v2678_v24, %v2674_v3 }
 0xd59   :  { %v1294_v13 = vmul.f32 %v2680_v25, %v2676_v7 }
 0xd5b   :  { %2374 = vmatprep.mubr.msk.f32.mxu1 %vm251_vm3, %v1294_v13 }
 0xd5c   :  { %2375 = vmatmul.mubr.msk.f32.vlgmr.msra.gmra.mrb[12].mxu1 %vm251_vm3, %v1295_v26 }
 0xd5d   :  { %2381 = vmatprep.mubr.msk.f32.mxu1 %vm165_vm1, %v1384_v27 }
 0xd60   :  { %2509 = vmatpush3.bf16.xpose.msk.msra.mxu1 %vm2927_vm2, %v2504_v23 }
 0xd67   :  { %2382 = vmatmul.mubr.msk.f32.vlgmr.msra.gmra.mrb[14].mxu1 %vm165_vm1, %v1386_v28 }
 0xe2f   :  { %v3092_v29 = vpop.f32.mrb[12].mxu1 }
 0xe30   :  { %v3094_v30 = vpop.f32.mrb[13].mxu1 }
 0xe3a   :  { %v2383_v52 = vpop.f32.mrb[14].mxu1 }
 0xe3b   :  { %v1465_v32 = vpop.f32.mrb[15].mxu1  ;;  %v1477_v33 = vsel %vm251_vm3, %v2383_v52, -inf }
 0xe3c   :  { %1478 = vmax.xlane.f32.xlu0 %v1477_v33  ;;  %v1474_v34 = vsel %vm251_vm3, %v1465_v32, -inf }
 0xe3d   :  { %1475 = vmax.xlane.f32.xlu1 %v1474_v34 }
 0xec9   :  { %v1479_v36 = vpop.xlane.xlu0 %1478 }
 0xeca   :  { %v1481_v8 = vsub.f32 %v2383_v52, %v1479_v36  ;;  %v1476_v38 = vpop.xlane.xlu1 %1475 }
 0xecb   :  { %v1480_v39 = vsub.f32 %v1465_v32, %v1476_v38 }
 0xecc   :  { %v1484_v40 = vmul.f32 1.442695, %v1481_v8 }
 0xecd   :  { %v1482_v41 = vmul.f32 1.442695, %v1480_v39 }
 0xece   :  { %2681 = vpow2.f32 %v1484_v40 }
 0xecf   :  { %2683 = vpow2.f32 %v1482_v41 }
 0xed8   :  { %v2682_v42 = vpop.eup %2681 }
 0xed9   :  { %v2684_v43 = vpop.eup %2683  ;;  %v1489_v44 = vsel %vm251_vm3, %v2682_v42, 0.0 }
 0xeda   :  { %1490 = vadd.xlane.f32.xlu1 %v1489_v44  ;;  %v1486_v45 = vsel %vm251_vm3, %v2684_v43, 0.0 }
 0xedb   :  { %1487 = vadd.xlane.f32.xlu0 %v1486_v45 }
 0xeeb   :  { %2622 = vrot.lane.b32.xlu1 %v3031_v31, %s2809_s11 }
 0xeef   :  { %1583 = vrot.lane.b32.xlu1 %v3054_v54, %s2810_s12 }
 0xef1   :  { %2617 = vrot.lane.b32.xlu0 %v3031_v31, %s2808_s10 }
 0xef5   :  { %1585 = vrot.lane.b32.xlu0 %v3061_v51, %s2810_s12 }
 0xf67   :  { %v1491_v46 = vpop.xlane.xlu1 %1490 }
 0xf68   :  { %2685 = vrcp.f32 %v1491_v46  ;;  %v1488_v47 = vpop.xlane.xlu0 %1487 }
 0xf69   :  { %2687 = vrcp.f32 %v1488_v47 }
 0xf6b   :  { %v2623_v48 = vpop.permute.xlu1 %2622 }
 0xf6c   :  { %v2618_v49 = vpop.permute.xlu0 %2617  ;;  %v2625_v50 = vunpack.i.h.bf16 %v2623_v48  ;;  %v2624_v53 = vunpack.i.l.bf16 %v2623_v48 }
 0xf6d   :  { %v2620_v14 = vunpack.i.h.bf16 %v2618_v49  ;;  %v2619_v55 = vunpack.i.l.bf16 %v2618_v49 }
 0xf6e   :  { %v2514_v57 = vpack.c.bf16 %v2625_v50, %v2624_v53 }
 0xf6f   :  { %v2510_v56 = vpack.c.bf16 %v2620_v14, %v2619_v55  ;;  %v1584_v62 = vpop.permute.xlu1 %1583 }
 0xf70   :  { %v1586_v63 = vpop.permute.xlu0 %1585 }
 0xf71   :  { %2511 = vmatprep.subr.bf16.mxu0 %v2510_v56 }
 0xf72   :  { %v2686_v58 = vpop.eup %2685  ;;  %2513 = vmatpush3.bf16.msra.mxu0 %v2510_v56 }
 0xf73   :  { %v2688_v59 = vpop.eup %2687  ;;  %2516 = vmatprep.subr.msk.bf16.mxu0 %vm2927_vm2, %v2514_v57  ;;  %v1495_v61 = vmul.f32 %v2686_v58, %v2682_v42 }
 0xf74   :  { %v1494_v60 = vmul.f32 %v2688_v59, %v2684_v43 }
 0xf76   :  { %2388 = vmatprep.mubr.msk.f32.mxu0 %vm251_vm3, %v1494_v60 }
 0xf77   :  { %2389 = vmatmul.mubr.msk.f32.vlgmr.msra.gmra.mrb[12].mxu0 %vm251_vm3, %v1495_v61 }
 0xf78   :  { %2395 = vmatprep.mubr.msk.f32.mxu0 %vm165_vm1, %v1584_v62 }
 0xf7b   :  { %2519 = vmatpush3.bf16.xpose.msk.msra.mxu0 %vm2927_vm2, %v2514_v57 }
 0xf82   :  { %2396 = vmatmul.mubr.msk.f32.vlgmr.msra.gmra.mrb[14].mxu0 %vm165_vm1, %v1586_v63 }
0x104a   :  { %v3116_v0 = vpop.f32.mrb[12].mxu0 }
0x104b   :  { %v3118_v1 = vpop.f32.mrb[13].mxu0 }
0x1055   :  { %v2397_v2 = vpop.f32.mrb[14].mxu0 }
0x1056   :  { %v1665_v4 = vpop.f32.mrb[15].mxu0  ;;  %v1677_v5 = vsel %vm251_vm3, %v2397_v2, -inf }
0x1057   :  { %1678 = vmax.xlane.f32.xlu0 %v1677_v5  ;;  %v1674_v3 = vsel %vm251_vm3, %v1665_v4, -inf }
0x1058   :  { %1675 = vmax.xlane.f32.xlu1 %v1674_v3 }
0x10e4   :  { %v1679_v7 = vpop.xlane.xlu0 %1678 }
0x10e5   :  { %v1681_v6 = vsub.f32 %v2397_v2, %v1679_v7  ;;  %v1676_v9 = vpop.xlane.xlu1 %1675 }
0x10e6   :  { %v1680_v10 = vsub.f32 %v1665_v4, %v1676_v9 }
0x10e7   :  { %v1684_v11 = vmul.f32 1.442695, %v1681_v6 }
0x10e8   :  { %v1682_v12 = vmul.f32 1.442695, %v1680_v10 }
0x10e9   :  { %2689 = vpow2.f32 %v1684_v11 }
0x10ea   :  { %2691 = vpow2.f32 %v1682_v12 }
0x10f3   :  { %v2690_v15 = vpop.eup %2689 }
0x10f4   :  { %v2692_v16 = vpop.eup %2691  ;;  %v1689_v17 = vsel %vm251_vm3, %v2690_v15, 0.0 }
0x10f5   :  { %1690 = vadd.xlane.f32.xlu1 %v1689_v17  ;;  %v1686_v19 = vsel %vm251_vm3, %v2692_v16, 0.0 }
0x10f6   :  { %1687 = vadd.xlane.f32.xlu0 %v1686_v19 }
0x1106   :  { %2632 = vrot.lane.b32.xlu1 %v3031_v31, %s2811_s13 }
0x110a   :  { %1783 = vrot.lane.b32.xlu1 %v3054_v54, %s2812_s14 }
0x110c   :  { %2627 = vrot.lane.b32.xlu0 %v3031_v31, %s2813_s15 }
0x1110   :  { %1785 = vrot.lane.b32.xlu0 %v3061_v51, %s2812_s14 }
0x1182   :  { %v1691_v21 = vpop.xlane.xlu1 %1690 }
0x1183   :  { %2693 = vrcp.f32 %v1691_v21  ;;  %v1688_v22 = vpop.xlane.xlu0 %1687 }
0x1184   :  { %2695 = vrcp.f32 %v1688_v22 }
0x1186   :  { %v2633_v23 = vpop.permute.xlu1 %2632 }
0x1187   :  { %v2628_v24 = vpop.permute.xlu0 %2627  ;;  %v2635_v25 = vunpack.i.h.bf16 %v2633_v23  ;;  %v2634_v13 = vunpack.i.l.bf16 %v2633_v23 }
0x1188   :  { %v2630_v26 = vunpack.i.h.bf16 %v2628_v24  ;;  %v2629_v27 = vunpack.i.l.bf16 %v2628_v24 }
0x1189   :  { %v2524_v52 = vpack.c.bf16 %v2635_v25, %v2634_v13 }
0x118a   :  { %v2520_v28 = vpack.c.bf16 %v2630_v26, %v2629_v27  ;;  %v1784_v34 = vpop.permute.xlu1 %1783 }
0x118b   :  { %v1786_v36 = vpop.permute.xlu0 %1785 }
0x118c   :  { %2521 = vmatprep.subr.bf16.mxu1 %v2520_v28 }
0x118d   :  { %v2694_v54 = vpop.eup %2693  ;;  %2523 = vmatpush3.bf16.msra.mxu1 %v2520_v28 }
0x118e   :  { %v2696_v32 = vpop.eup %2695  ;;  %2526 = vmatprep.subr.msk.bf16.mxu1 %vm2927_vm2, %v2524_v52  ;;  %v1695_v33 = vmul.f32 %v2694_v54, %v2690_v15 }
0x118f   :  { %v1694_v51 = vmul.f32 %v2696_v32, %v2692_v16 }
0x1191   :  { %2402 = vmatprep.mubr.msk.f32.mxu1 %vm251_vm3, %v1694_v51 }
0x1192   :  { %2403 = vmatmul.mubr.msk.f32.vlgmr.msra.gmra.mrb[16].mxu1 %vm251_vm3, %v1695_v33 }
0x1193   :  { %2409 = vmatprep.mubr.msk.f32.mxu1 %vm165_vm1, %v1784_v34 }
0x1196   :  { %2529 = vmatpush3.bf16.xpose.msk.msra.mxu1 %vm2927_vm2, %v2524_v52 }
0x119d   :  { %2410 = vmatmul.mubr.msk.f32.vlgmr.msra.gmra.mrb[18].mxu1 %vm165_vm1, %v1786_v36 }
0x1265   :  { %v2404_v8 = vpop.f32.mrb[16].mxu1 }
0x1266   :  { %v1774_v38 = vpop.f32.mrb[17].mxu1 }
0x1270   :  { %v2411_v39 = vpop.f32.mrb[18].mxu1 }
0x1271   :  { %v1865_v40 = vpop.f32.mrb[19].mxu1  ;;  %v1877_v41 = vsel %vm251_vm3, %v2411_v39, -inf }
0x1272   :  { %1878 = vmax.xlane.f32.xlu0 %v1877_v41  ;;  %v1874_v42 = vsel %vm251_vm3, %v1865_v40, -inf }
0x1273   :  { %1875 = vmax.xlane.f32.xlu1 %v1874_v42 }
0x12ff   :  { %v1879_v43 = vpop.xlane.xlu0 %1878 }
0x1300   :  { %v1881_v44 = vsub.f32 %v2411_v39, %v1879_v43  ;;  %v1876_v45 = vpop.xlane.xlu1 %1875 }
0x1301   :  { %v1880_v46 = vsub.f32 %v1865_v40, %v1876_v45 }
0x1302   :  { %v1884_v47 = vmul.f32 1.442695, %v1881_v44 }
0x1303   :  { %v1882_v18 = vmul.f32 1.442695, %v1880_v46 }
0x1304   :  { %2697 = vpow2.f32 %v1884_v47 }
0x1305   :  { %2699 = vpow2.f32 %v1882_v18 }
0x130e   :  { %v2698_v48 = vpop.eup %2697 }
0x130f   :  { %v2700_v49 = vpop.eup %2699  ;;  %v1889_v50 = vsel %vm251_vm3, %v2698_v48, 0.0 }
0x1310   :  { %1890 = vadd.xlane.f32.xlu1 %v1889_v50  ;;  %v1886_v53 = vsel %vm251_vm3, %v2700_v49, 0.0 }
0x1311   :  { %1887 = vadd.xlane.f32.xlu0 %v1886_v53 }
0x1321   :  { %1985 = vrot.lane.b32.xlu1 %v3118_v1, %s2802_s6 }
0x1325   :  { %1987 = vrot.lane.b32.xlu1 %v3116_v0, %s2802_s6 }
0x1327   :  { %2637 = vrot.lane.b32.xlu0 %v3031_v31, %s2814_s16 }
0x1329   :  { %1995 = vrot.lane.b32.xlu1 %v2404_v8, %s2815_s1 }
0x132b   :  { %1993 = vrot.lane.b32.xlu0 %v1774_v38, %s2815_s1 }
0x139d   :  { %v1891_v14 = vpop.xlane.xlu1 %1890 }
0x139e   :  { %2701 = vrcp.f32 %v1891_v14  ;;  %v1888_v55 = vpop.xlane.xlu0 %1887 }
0x139f   :  { %2703 = vrcp.f32 %v1888_v55 }
0x13a1   :  { %v1986_v1 = vpop.permute.xlu1 %1985 }
0x13a2   :  { %v2638_v56 = vpop.permute.xlu0 %2637  ;;  %v2007_v3 = vsel %vm165_vm1, %v3094_v30, %v1986_v1 }
0x13a3   :  { %v2640_v57 = vunpack.i.h.bf16 %v2638_v56  ;;  %v2639_v58 = vunpack.i.l.bf16 %v2638_v56 }
0x13a5   :  { %v2530_v59 = vpack.c.bf16 %v2640_v57, %v2639_v58  ;;  %v1988_v2 = vpop.permute.xlu1 %1987 }
0x13a6   :  { %v1994_v5 = vpop.permute.xlu0 %1993 }
0x13a7   :  { %2531 = vmatprep.subr.bf16.mxu0 %v2530_v59  ;;  %v2009_v6 = vsel %vm251_vm3, %v2007_v3, %v1994_v5 }
0x13a8   :  { %v2702_v60 = vpop.eup %2701  ;;  %2533 = vmatpush3.bf16.msra.mxu0 %v2530_v59 }
0x13a9   :  { %v2704_v61 = vpop.eup %2703  ;;  %2535 = vmatprep.subr.bf16.mxu0 %v3035_v35  ;;  %v1895_v31 = vmul.f32 %v2702_v60, %v2698_v48  ;;  %v1996_v4 = vpop.permute.xlu1 %1995 }
0x13aa   :  { %v1894_v62 = vmul.f32 %v2704_v61, %v2700_v49 }
0x13ac   :  { %2416 = vmatprep.mubr.msk.f32.mxu0 %vm251_vm3, %v1894_v62 }
0x13ad   :  { %2417 = vmatmul.mubr.msk.f32.vlgmr.msra.gmra.mrb[16].mxu0 %vm251_vm3, %v1895_v31 }
0x13ae   :  { %2537 = vmatpush3.bf16.msra.mxu0 %v3035_v35  ;;  %v2008_v35 = vsel %vm165_vm1, %v3092_v29, %v1988_v2 }
0x13af   :  { %2539 = vmatprep.subr.bf16.mxu0 %v3037_v37  ;;  %v2010_v9 = vsel %vm251_vm3, %v2008_v35, %v1996_v4 }
0x13b2   :  { %2541 = vmatpush3.bf16.msra.mxu0 %v3037_v37 }
0x1480   :  { %v2418_v63 = vpop.f32.mrb[16].mxu0 }
0x1481   :  { %2003 = vrot.lane.b32.xlu1 %v2418_v63, %s2816_s17  ;;  %v1974_v0 = vpop.f32.mrb[17].mxu0 }
0x1482   :  { %2001 = vrot.lane.b32.xlu0 %v1974_v0, %s2816_s17 }
0x14f3   :  { %v2004_v7 = vpop.permute.xlu1 %2003 }
0x14f4   :  { %v2002_v37 = vpop.permute.xlu0 %2001  ;;  %v2012_v11 = vsel %vm989_vm4, %v2010_v9, %v2004_v7 }
0x14f5   :  { %v2011_v10 = vsel %vm989_vm4, %v2009_v6, %v2002_v37 }
0x14f6   :  { %2427 = vmatprep.mubr.msk.f32.mxu0 %vm75_vm0, %v2011_v10 }
0x14f7   :  { %2428 = vmatmul.mubr.msk.f32.vlgmr.msra.gmra.mrb[18].mxu0 %vm75_vm0, %v2012_v11 }
0x15ca   :  { %v2429_v30 = vpop.f32.mrb[18].mxu0 }
0x15cb   :  { %v2102_v12 = vadd.f32 %v2429_v30, %v3068_v20  ;;  %v2096_v15 = vpop.f32.mrb[19].mxu0 }
0x15cc   :  { %v2097_v29 = vadd.f32 %v3068_v20, %v2096_v15 }
0x15cd   :  { %2107 = vst [vmem:[#allocation8 + $0x18] sm:$0xff] %v2102_v12 }
0x15ce   :  { %2106 = vst [vmem:[#allocation8 + $0x10] sm:$0xff] %v2097_v29 }
0x15cf   :  { %2782 = shalt.err (!%p2779_p0)
}
0x15d0   :  { %s2783_s25 = scalar_lea.hbm %s3192_s5, 512 }
0x15d1   :  { %p2784_p1 = scmp.ne.s32.totalorder %s3192_s5, %s2783_s25  ;;  %p2787_p2 = scmp.lt.u32.totalorder %s2783_s25, %s3192_s5 }
0x15d3   :  { %p2789_p3 = pnand %p2787_p2, %p2784_p1 }
0x15d5   :  { %2792 = shalt.err (!%p2789_p3)
}
0x15d6   :  { %2119 = dma.vmem_to_hbm [thread:$0]  %s2114_s20, 512, %s3192_s5, [#allocation4], %s2801_s30, %s2801_s30, %s2802_s6  }
0x15d7   :  { %2797 = dma.done.wait [#allocation4], 512  }
0x15d8   :  { %2798 = vsyncadd [#allocation4], 4294966784 }
0x15d9   :  { %2123 = vsyncpa [#allocation3], 1 }
0x15da   :  { %2124 = vsyncpa [#allocation6], 1 }
0x15db   :  { %2125 = vsyncpa [#allocation4], 1 }

</bundles_post_ra>
